<compile_context>
chip_gen: v7x
topology: tpu7x:2x2x1
jax: 0.10.0
libtpu: 0.0.40
codegen_flags: <defaults>
</compile_context>

<pallas_src>
import jax
import jax.numpy as jnp
from jax.experimental import pallas as pl
from jax.experimental.pallas import tpu as pltpu

LANE = 128
NEG_MASK = -1e30   # finite! (-inf would give 0 * -inf = NaN in the accumulation)


def cnn_kernel(patch_ref, w_ref, b_ref, wl_ref, bl_ref, out_ref):
    TB, L, KP = patch_ref.shape
    C3 = w_ref.shape[-1]

    # --- all three valid convolutions as ONE wide MXU matmul (bf16 -> f32).
    #     The 3 flag K-lanes inject ~-1e30 into every invalid tail time-step
    #     of its branch, so no per-element validity select is needed below. ---
    patch = patch_ref[...].reshape(TB * L, KP)                       # bf16
    acc = jnp.dot(patch, w_ref[...], preferred_element_type=jnp.float32)
    acc = acc.reshape(TB, L, C3)       # acc[b, t, i*Cp + c] = conv_i[b, t, c]

    # --- max-pool over time (masked rows carry ~-1e30 -> never selected) ---
    pooled = jnp.max(acc, axis=1)                                    # (TB, C3)

    # --- bias + ReLU after the pool (exact: bias is t-constant, ReLU monotone)
    pooled = jnp.maximum(pooled + b_ref[...], 0.0)

    # --- head (dropout == identity in eval): (1,C3) . (TB,C3)^T -> (1,TB),
    #     i.e. the result lands lane-dense for an unmasked output store. ---
    head = jnp.einsum('xc,bc->xb', wl_ref[...], pooled,
                      preferred_element_type=jnp.float32)            # (1, TB)
    out_ref[...] = (head + bl_ref[0, 0]).reshape(1, 1, TB)


def _pack_fused_params(w0, b0, w1, b1, w2, b2, wl, D, C):
    """Zero-pad each conv branch to kernel-height 5 and Cp=128 lanes, fuse
    along the output (N) axis, add the -1e30 mask weights on the 3 flag
    K-lanes, and lay out the head weight to match."""
    Cp = -(-C // LANE) * LANE
    KP = -(-(5 * D + 3) // LANE) * LANE          # +3 reserved flag K-lanes
    Wf = jnp.zeros((KP, 3 * Cp), jnp.float32)
    bf = jnp.zeros((1, 3 * Cp), jnp.float32)
    wlf = jnp.zeros((1, 3 * Cp), jnp.float32)
    for i, (w, b, k) in enumerate(((w0, b0, 3), (w1, b1, 4), (w2, b2, 5))):
        Wf = Wf.at[:k * D, i * Cp:i * Cp + C].set(w.reshape(k * D, C))
        # flag lane i: invalid time-steps carry 1.0 there -> acc ~ -1e30,
        # so the plain time-axis max never selects them.
        Wf = Wf.at[5 * D + i, i * Cp:i * Cp + C].set(NEG_MASK)
        bf = bf.at[0, i * Cp:i * Cp + C].set(b[0])
        wlf = wlf.at[0, i * Cp:i * Cp + C].set(wl[i * C:(i + 1) * C, 0])
    return Wf.astype(jnp.bfloat16), bf, wlf, Cp, KP


def cnn_forward(x_tokens, vocab_vectors, w0, b0, w1, b1, w2, b2, wl, bl):
    B, L = x_tokens.shape
    D = vocab_vectors.shape[1]
    C = w0.shape[-1]
    if L < 5:
        raise ValueError("sequence length must be >= 5 (largest conv kernel)")

    # Glue (no FLOPs): embedding gather + im2col window layout, bf16 operands.
    # TODO(synk): if profiling shows this glue / patch HBM traffic dominating
    # (mainly v5e), fuse im2col into the kernel via memory_space=pl.ANY + DMA.
    emb = vocab_vectors[x_tokens].astype(jnp.bfloat16)           # (B, L, D)
    emb_p = jnp.pad(emb, ((0, 0), (0, 4), (0, 0)))               # (B, L+4, D)
    patch = jnp.concatenate([emb_p[:, j:j + L, :] for j in range(5)], axis=-1)

    # Flag lanes for the MXU mask trick: flag i is 1.0 exactly where time-step
    # t is invalid for conv branch i (kernel k = 3+i is valid for t <= L-3-i).
    t = jnp.arange(L)
    flags = jnp.stack([(t + i) > (L - 3) for i in range(3)], axis=-1)
    flags = jnp.broadcast_to(flags[None].astype(jnp.bfloat16), (B, L, 3))
    patch = jnp.concatenate([patch, flags], axis=-1)             # (B, L, 5D+3)

    Wf, bf, wlf, Cp, KP = _pack_fused_params(w0, b0, w1, b1, w2, b2, wl, D, C)
    patch = jnp.pad(patch, ((0, 0), (0, 0), (0, KP - 5 * D - 3)))  # lane-pad K

    # --- generation-aware tiling -------------------------------------------
    # Row budget M = TB*L: 4096 keeps the f32 (M, 384) accumulator (~6 MiB)
    # plus double-buffered bf16 patch tiles (~2 MiB) inside v7x's 32 MiB scoped
    # VMEM; on v5e/v6e (128 MiB physical VMEM) go to 8192 rows / 64 MiB.
    row_budget, vmem_limit = 4096, 32 * 1024 * 1024
    try:
        if pltpu.get_tpu_info().vmem_capacity_bytes >= 128 * 1024 * 1024:
            row_budget, vmem_limit = 8192, 64 * 1024 * 1024
    except Exception:
        pass

    TB = min(B, max(1, row_budget // L))
    if TB < B:
        TB = max(8, (TB // 8) * 8)       # sublane-align the batch tile
    elif B >= 16:
        # keep >= 2 grid steps so both v7x TensorCores get work
        TB = max(8, ((B // 2) // 8) * 8)
    # TODO(synk): for very long sequences (L ~> 2000) the TB=8 floor makes the
    # f32 accumulator exceed the scoped VMEM limit; tile over L with an
    # "arbitrary" grid axis + running-max VMEM scratch instead.
    Bp = -(-B // TB) * TB
    if Bp != B:
        patch = jnp.pad(patch, ((0, Bp - B), (0, 0), (0, 0)))
    grid = Bp // TB

    out = pl.pallas_call(
        cnn_kernel,
        out_shape=jax.ShapeDtypeStruct((grid, 1, TB), jnp.float32),
        grid_spec=pltpu.PrefetchScalarGridSpec(
            num_scalar_prefetch=0,
            grid=(grid,),
            in_specs=[
                pl.BlockSpec((TB, L, KP), lambda i: (i, 0, 0)),      # patch tile
                pl.BlockSpec((KP, 3 * Cp), lambda i: (0, 0)),        # fused conv W (+mask rows)
                pl.BlockSpec((1, 3 * Cp), lambda i: (0, 0)),         # fused conv bias
                pl.BlockSpec((1, 3 * Cp), lambda i: (0, 0)),         # fused head weight
                pl.BlockSpec(memory_space=pltpu.MemorySpace.SMEM),   # head bias scalar
            ],
            out_specs=pl.BlockSpec((1, 1, TB), lambda i: (i, 0, 0)),  # lane-dense
        ),
        compiler_params=pltpu.CompilerParams(
            dimension_semantics=("parallel",),       # 2 TCs on v7x; no-op v5e/v6e
            vmem_limit_bytes=vmem_limit,
        ),
    )(patch, Wf, bf, wlf, bl)
    return out.reshape(Bp)[:B]                       # matches .squeeze()


def reference_forward(x_tokens, vocab_vectors, w0, b0, w1, b1, w2, b2, wl, bl):
    """Pure-JAX reference using the same bf16-rounded matmul operands."""
    emb = vocab_vectors[x_tokens].astype(jnp.bfloat16)
    L = emb.shape[1]

    def branch(w, b, k):
        T = L - k + 1
        wq = w.astype(jnp.bfloat16)
        acc = sum(jnp.einsum('btd,dc->btc', emb[:, j:j + T, :], wq[j],
                             preferred_element_type=jnp.float32)
                  for j in range(k)) + b
        return jnp.max(jnp.maximum(acc, 0.0), axis=1)

    cat = jnp.concatenate([branch(w0, b0, 3), branch(w1, b1, 4),
                           branch(w2, b2, 5)], axis=1)
    return jnp.sum(cat * wl[:, 0][None, :], axis=1) + bl[0, 0]


def make_params(key, vocab_size, emb_dim, c_out):
    ks = jax.random.split(key, 9)
    scale = 0.1
    vocab_vectors = jax.random.normal(ks[0], (vocab_size, emb_dim), jnp.float32)
    # PyTorch conv weights are (C_out, 1, k, D); stored here as (k, D, C_out).
    w0 = scale * jax.random.normal(ks[1], (3, emb_dim, c_out), jnp.float32)
    w1 = scale * jax.random.normal(ks[2], (4, emb_dim, c_out), jnp.float32)
    w2 = scale * jax.random.normal(ks[3], (5, emb_dim, c_out), jnp.float32)
    b0 = scale * jax.random.normal(ks[4], (1, c_out), jnp.float32)
    b1 = scale * jax.random.normal(ks[5], (1, c_out), jnp.float32)
    b2 = scale * jax.random.normal(ks[6], (1, c_out), jnp.float32)
    # Linear(3*C_out, 1): weight stored as (3*C_out, 1), bias as (1, 1).
    wl = scale * jax.random.normal(ks[7], (3 * c_out, 1), jnp.float32)
    bl = scale * jax.random.normal(ks[8], (1, 1), jnp.float32)
    return vocab_vectors, w0, b0, w1, b1, w2, b2, wl, bl


if __name__ == "__main__":
    key = jax.random.PRNGKey(0)
    VOCAB, EMB_DIM, C_OUT = 50, 25, 100      # glove-twitter-25 -> emb_dim 25
    B, L = 2, 8                              # seq len >= 5 (largest conv kernel)

    pkey, xkey = jax.random.split(key)
    params = make_params(pkey, VOCAB, EMB_DIM, C_OUT)
    x = jax.random.randint(xkey, (B, L), 0, VOCAB, dtype=jnp.int32)

    y = cnn_forward(x, *params)
    jax.block_until_ready(y)
    assert y.shape == (B,)

    y_ref = reference_forward(x, *params)
    assert float(jnp.max(jnp.abs(y - y_ref))) < 5e-2, (y, y_ref)
    print("KERNEL_OK")
</pallas_src>

<mosaic_0001>
module attributes {stable_mosaic.version = 11 : i64} {
  func.func @cnn_kernel(%arg0: i32, %arg1: memref<2x8x128xbf16, #tpu.memory_space<vmem>>, %arg2: memref<128x384xbf16, #tpu.memory_space<vmem>>, %arg3: memref<1x384xf32, #tpu.memory_space<vmem>>, %arg4: memref<1x384xf32, #tpu.memory_space<vmem>>, %arg5: memref<1x1xf32, #tpu.memory_space<smem>>, %arg6: memref<1x1x2xf32, #tpu.memory_space<vmem>>) attributes {dimension_semantics = [#tpu.dimension_semantics<parallel>], iteration_bounds = array<i64: 1>, scalar_prefetch = 0 : i64, scratch_operands = 0 : i64, tpu.core_type = #tpu.core_type<tc>, window_params = [{transform_indices = @transform_0, window_bounds = array<i64: 2, 8, 128>}, {pipeline_mode = #tpu.pipeline_mode<synchronous>, transform_indices = @transform_1, window_bounds = array<i64: 128, 384>}, {pipeline_mode = #tpu.pipeline_mode<synchronous>, transform_indices = @transform_2, window_bounds = array<i64: 1, 384>}, {pipeline_mode = #tpu.pipeline_mode<synchronous>, transform_indices = @transform_3, window_bounds = array<i64: 1, 384>}, {transform_indices = @transform_4, window_bounds = array<i64: 1, 1>}, {transform_indices = @transform_5, window_bounds = array<i64: 1, 1, 2>}]} {
    %c0 = arith.constant 0 : index
    %c0_0 = arith.constant 0 : index
    %c0_1 = arith.constant 0 : index
    %0 = vector.load %arg1[%c0, %c0_0, %c0_1] : memref<2x8x128xbf16, #tpu.memory_space<vmem>>, vector<2x8x128xbf16>
    %1 = vector.shape_cast %0 : vector<2x8x128xbf16> to vector<16x128xbf16>
    %c0_2 = arith.constant 0 : index
    %c0_3 = arith.constant 0 : index
    %2 = vector.load %arg2[%c0_2, %c0_3] : memref<128x384xbf16, #tpu.memory_space<vmem>>, vector<128x384xbf16>
    %cst = arith.constant dense<0.000000e+00> : vector<16x384xf32>
    %3 = tpu.matmul %1, %2, %cst {dimension_numbers = #tpu.dot_dimension_numbers<[1], [0], [0], [1], [0, 0, 1, 1], [], []>} : vector<16x128xbf16>, vector<128x384xbf16>, vector<16x384xf32> -> vector<16x384xf32>
    %4 = vector.shape_cast %3 : vector<16x384xf32> to vector<2x8x384xf32>
    %cst_4 = arith.constant dense<0xFF800000> : vector<2x384xf32>
    %5 = vector.multi_reduction <maximumf>, %4, %cst_4 [1] : vector<2x8x384xf32> to vector<2x384xf32>
    %c0_5 = arith.constant 0 : index
    %c0_6 = arith.constant 0 : index
    %6 = vector.load %arg3[%c0_5, %c0_6] : memref<1x384xf32, #tpu.memory_space<vmem>>, vector<1x384xf32>
    %7 = vector.broadcast %6 : vector<1x384xf32> to vector<2x384xf32>
    %8 = arith.addf %5, %7 : vector<2x384xf32>
    %cst_7 = arith.constant 0.000000e+00 : f32
    %9 = vector.broadcast %cst_7 : f32 to vector<2x384xf32>
    %10 = arith.maximumf %8, %9 : vector<2x384xf32>
    %c0_8 = arith.constant 0 : index
    %c0_9 = arith.constant 0 : index
    %11 = vector.load %arg4[%c0_8, %c0_9] : memref<1x384xf32, #tpu.memory_space<vmem>>, vector<1x384xf32>
    "tpu.trace_start"() <{level = 10 : i32, message = "xc,bc->xb"}> : () -> ()
    %cst_10 = arith.constant dense<0.000000e+00> : vector<1x2xf32>
    %12 = tpu.matmul %11, %10, %cst_10 {dimension_numbers = #tpu.dot_dimension_numbers<[1], [1], [0], [0], [0, 0, 1, 0], [], []>} : vector<1x384xf32>, vector<2x384xf32>, vector<1x2xf32> -> vector<1x2xf32>
    "tpu.trace_stop"() : () -> ()
    %c0_11 = arith.constant 0 : index
    %c0_12 = arith.constant 0 : index
    %13 = memref.load %arg5[%c0_11, %c0_12] : memref<1x1xf32, #tpu.memory_space<smem>>
    %14 = vector.broadcast %13 : f32 to vector<1x2xf32>
    %15 = arith.addf %12, %14 : vector<1x2xf32>
    %16 = vector.shape_cast %15 : vector<1x2xf32> to vector<1x1x2xf32>
    %c0_13 = arith.constant 0 : index
    %c0_14 = arith.constant 0 : index
    %c0_15 = arith.constant 0 : index
    %17 = vector.load %arg6[%c0_13, %c0_14, %c0_15] : memref<1x1x2xf32, #tpu.memory_space<vmem>>, vector<1x1x2xf32>
    tpu.vector_store %arg6[%c0_13, %c0_14, %c0_15], %16 {strides = array<i32>} : memref<1x1x2xf32, #tpu.memory_space<vmem>>, vector<1x1x2xf32>,
    return
  }
  func.func @transform_0(%arg0: i32) -> (i32, i32, i32) {
    %c0_i32 = arith.constant 0 : i32
    %c0_i32_0 = arith.constant 0 : i32
    %c0_i32_1 = arith.constant 0 : i32
    return %arg0, %c0_i32, %c0_i32_0 : i32, i32, i32
  }
  func.func @transform_1(%arg0: i32) -> (i32, i32) {
    %c0_i32 = arith.constant 0 : i32
    %c0_i32_0 = arith.constant 0 : i32
    %c0_i32_1 = arith.constant 0 : i32
    return %c0_i32, %c0_i32_0 : i32, i32
  }
  func.func @transform_2(%arg0: i32) -> (i32, i32) {
    %c0_i32 = arith.constant 0 : i32
    %c0_i32_0 = arith.constant 0 : i32
    %c0_i32_1 = arith.constant 0 : i32
    return %c0_i32, %c0_i32_0 : i32, i32
  }
  func.func @transform_3(%arg0: i32) -> (i32, i32) {
    %c0_i32 = arith.constant 0 : i32
    %c0_i32_0 = arith.constant 0 : i32
    %c0_i32_1 = arith.constant 0 : i32
    return %c0_i32, %c0_i32_0 : i32, i32
  }
  func.func @transform_4(%arg0: i32) -> (i32, i32) {
    %c0_i32 = arith.constant 0 : i32
    %c0_i32_0 = arith.constant 0 : i32
    %c0_i32_1 = arith.constant 0 : i32
    return %c0_i32, %c0_i32_0 : i32, i32
  }
  func.func @transform_5(%arg0: i32) -> (i32, i32, i32) {
    %c0_i32 = arith.constant 0 : i32
    %c0_i32_0 = arith.constant 0 : i32
    %c0_i32_1 = arith.constant 0 : i32
    return %arg0, %c0_i32, %c0_i32_0 : i32, i32, i32
  }
}

</mosaic_0001>

<bundles_post_ra>
// kernel: tpu_custom_call.1
= control target key start
LH: loop header
LB: loop body
LE: loop exit
PB: predicated region body
PF: predicated region fallthrough
CT: control target
= control target key end

     0   :  { %11 = vsyncpa [#allocation4], 0  ;;  %s843_s0 = inlined_call_operand.hbm [shape: bf16[2,8,128], index: 0, kind: input, shape index: {}]   ;;  %s844_s1 = inlined_call_operand.hbm [shape: bf16[128,384], index: 1, kind: input, shape index: {}]   ;;  %s845_s2 = inlined_call_operand.vmem [shape: f32[1,384], index: 2, kind: input, shape index: {}]   ;;  %s846_s3 = inlined_call_operand.vmem [shape: f32[1,384], index: 3, kind: input, shape index: {}]   ;;  %s847_s4 = inlined_call_operand.<no memory space> [shape: f32[1,1], index: 4, kind: input, shape index: {}]   ;;  %s848_s5 = inlined_call_operand.hbm [shape: f32[1,1,2], index: 5, kind: output, shape index: {}]  }
   0x1   :  { %12 = vsyncpa [#allocation7], 0 }
   0x2   :  { %13 = vsyncpa [#allocation5], 0  ;;  %s739_s18 = smov [#allocation3]   ;;  %s667_s22 = scalar_lea.hbm %s843_s0, 128 }
   0x3   :  { %s19_s19 = sshll.u32 %s739_s18, 4  ;;  %p668_p0 = scmp.ne.s32.totalorder %s843_s0, %s667_s22  ;;  %s20_s19 = int_to_ptr.vmem [resolvable:$true] %s19_s19 }
   0x4   :  { %p671_p1 = scmp.lt.u32.totalorder %s667_s22, %s843_s0 }
   0x6   :  { %p673_p2 = pnand %p671_p1, %p668_p0 }
   0x8   :  { %676 = shalt.err (!%p673_p2)
}
   0x9   :  { %s677_s27 = scalar_lea.vmem %s20_s19, 128  ;;  %p682_p4 = scmp.lt.s32.totalorder %s20_s19, %s20_s19 }
   0xa   :  { %p678_p3 = scmp.ne.s32.totalorder %s20_s19, %s677_s27  ;;  %p683_p5 = scmp.lt.s32.totalorder %s677_s27, %s677_s27 }
   0xc   :  { %p684_p6 = por %p683_p5, %p682_p4 }
   0xe   :  { %p685_p7 = pnand %p684_p6, %p678_p3 }
  0x10   :  { %688 = shalt.err (!%p685_p7)
}
  0x11   :  { %s740_s28 = smov 64   ;;  %s741_s29 = smov 4  }
  0x12   :  { %25 = dma.hbm_to_vmem [thread:$0]  %s843_s0, 128, %s20_s19, [#allocation4], %s740_s28, %s740_s28, %s741_s29  }
  0x13   :  { %s742_s7 = smov [#allocation6]   ;;  %s689_s11 = scalar_lea.hbm %s844_s1, 3072 }
  0x14   :  { %s31_s8 = sshll.u32 %s742_s7, 4  ;;  %p690_p8 = scmp.ne.s32.totalorder %s844_s1, %s689_s11  ;;  %s32_s8 = int_to_ptr.vmem [resolvable:$true] %s31_s8 }
  0x15   :  { %p693_p9 = scmp.lt.u32.totalorder %s689_s11, %s844_s1 }
  0x17   :  { %p695_p10 = pnand %p693_p9, %p690_p8 }
  0x19   :  { %698 = shalt.err (!%p695_p10)
}
  0x1a   :  { %s699_s16 = scalar_lea.vmem %s32_s8, 3072  ;;  %p704_p12 = scmp.lt.s32.totalorder %s32_s8, %s32_s8 }
  0x1b   :  { %p700_p11 = scmp.ne.s32.totalorder %s32_s8, %s699_s16  ;;  %p705_p13 = scmp.lt.s32.totalorder %s699_s16, %s699_s16 }
  0x1d   :  { %p706_p0 = por %p705_p13, %p704_p12 }
  0x1f   :  { %p707_p1 = pnand %p706_p0, %p700_p11 }
  0x21   :  { %710 = shalt.err (!%p707_p1)
}
  0x22   :  { %s743_s0 = smov 192   ;;  %s744_s17 = smov 12  }
  0x23   :  { %37 = dma.hbm_to_vmem [thread:$0]  %s844_s1, 3072, %s32_s8, [#allocation7], %s743_s0, %s743_s0, %s744_s17  }
  0x24   :  { %733 = dma.done.wait [#allocation4], 128  }
  0x25   :  { %734 = vsyncadd [#allocation4], 4294967168 }
  0x26   :  { %735 = dma.done.wait [#allocation7], 3072  }
  0x27   :  { %736 = vsyncadd [#allocation7], 4294964224  ;;  %v745_v0 = vmov 0.0   ;;  %vm746_vm0 = vmmov 0   ;;  %v747_v1 = vmov 0   ;;  %v666_v26 = vld [vmem:[#allocation3] sm:$0xff]   ;;  %v341_v27 = vlaneseq }
  0x28   :  { %597 = vmatprep.subr.bf16.mxu1 %v745_v0  ;;  %613 = vmatprep.mubr.msk.bf16.mxu1 %vm746_vm0, %v745_v0  ;;  %v634_v2 = vld [vmem:[#allocation6 + $0x4] ss:$12 sps:$4 sm:$0xff]   ;;  %v636_v3 = vld [vmem:[#allocation6 + $0x8] ss:$12 sps:$4 sm:$0xff]   ;;  %v637_v4 = vld [vmem:[#allocation6] ss:$12 sps:$4 sm:$0xff]  }
  0x29   :  { %251 = vmatprep.mubr.bf16.mxu0 %v747_v1  ;;  %219 = vmatprep.subr.bf16.mxu0 %v634_v2  ;;  %v638_v5 = vld [vmem:[#allocation6 + $0x1c] ss:$12 sps:$4 sm:$0xff]   ;;  %v640_v6 = vld [vmem:[#allocation6 + $0x20] ss:$12 sps:$4 sm:$0xff]   ;;  %v641_v7 = vld [vmem:[#allocation6 + $0x18] ss:$12 sps:$4 sm:$0xff]  }
  0x2a   :  { %598 = vmatpush3.bf16.msra.mxu1 %v636_v3  ;;  %220 = vmatpush1.bf16.msra.mxu0 %v637_v4  ;;  %v642_v8 = vld [vmem:[#allocation6 + $0x34] ss:$12 sps:$4 sm:$0xff]   ;;  %v644_v9 = vld [vmem:[#allocation6 + $0x38] ss:$12 sps:$4 sm:$0xff]   ;;  %v645_v10 = vld [vmem:[#allocation6 + $0x30] ss:$12 sps:$4 sm:$0xff]  }
  0x2b   :  { %599 = vmatprep.subr.bf16.mxu1 %v745_v0  ;;  %221 = vmatprep.subr.bf16.mxu0 %v638_v5  ;;  %v646_v11 = vld [vmem:[#allocation6 + $0x4c] ss:$12 sps:$4 sm:$0xff]   ;;  %v648_v12 = vld [vmem:[#allocation6 + $0x50] ss:$12 sps:$4 sm:$0xff]   ;;  %v649_v13 = vld [vmem:[#allocation6 + $0x48] ss:$12 sps:$4 sm:$0xff]  }
  0x2c   :  { %v650_v14 = vld [vmem:[#allocation6 + $0x64] ss:$12 sps:$4 sm:$0xff]   ;;  %v652_v15 = vld [vmem:[#allocation6 + $0x68] ss:$12 sps:$4 sm:$0xff]   ;;  %v653_v16 = vld [vmem:[#allocation6 + $0x60] ss:$12 sps:$4 sm:$0xff]  }
  0x2d   :  { %v654_v17 = vld [vmem:[#allocation6 + $0x7c] ss:$12 sps:$4 sm:$0xff]   ;;  %v656_v18 = vld [vmem:[#allocation6 + $0x80] ss:$12 sps:$4 sm:$0xff]   ;;  %v657_v19 = vld [vmem:[#allocation6 + $0x78] ss:$12 sps:$4 sm:$0xff]  }
  0x2e   :  { %600 = vmatpush3.bf16.msra.mxu1 %v640_v6  ;;  %222 = vmatpush1.bf16.msra.mxu0 %v641_v7  ;;  %v658_v20 = vld [vmem:[#allocation6 + $0x94] ss:$12 sps:$4 sm:$0xff]   ;;  %v660_v21 = vld [vmem:[#allocation6 + $0x98] ss:$12 sps:$4 sm:$0xff]   ;;  %v661_v22 = vld [vmem:[#allocation6 + $0x90] ss:$12 sps:$4 sm:$0xff]  }
  0x2f   :  { %601 = vmatprep.subr.bf16.mxu1 %v745_v0  ;;  %223 = vmatprep.subr.bf16.mxu0 %v642_v8  ;;  %v662_v23 = vld [vmem:[#allocation6 + $0xac] ss:$12 sps:$4 sm:$0xff]   ;;  %v664_v24 = vld [vmem:[#allocation6 + $0xb0] ss:$12 sps:$4 sm:$0xff]   ;;  %v665_v25 = vld [vmem:[#allocation6 + $0xa8] ss:$12 sps:$4 sm:$0xff]  }
  0x30   :  { %v342_v28 = vshrl.u32 %v341_v27, 7  ;;  %v368_v31 = vld [vmem:[%s846_s3] sm:$0x7]  ;;  %vm394_vm1 = vcmask 1041409   ;;  %s748_s23 = smov [#allocation8]   ;;  %vm543_vm2 = vcmask 8192  }
  0x31   :  { %v339_v52 = vld [vmem:[%s845_s2] sm:$0x7]  ;;  %s551_s24 = sshll.u32 %s748_s23, 4  ;;  %s552_s24 = int_to_ptr.vmem [resolvable:$true] %s551_s24 }
  0x32   :  { %602 = vmatpush3.bf16.msra.mxu1 %v644_v9  ;;  %224 = vmatpush1.bf16.msra.mxu0 %v645_v10  ;;  %v343_v29 = vsub.s32 0, %v342_v28  ;;  %v347_v30 = vsub.s32 1, %v342_v28  ;;  %v351_v32 = vsub.s32 2, %v342_v28  ;;  %s711_s25 = scalar_lea.vmem %s552_s24, 16  ;;  %s715_s26 = scalar_lea.vmem %s552_s24, 32 }
  0x33   :  { %603 = vmatprep.subr.bf16.mxu1 %v745_v0  ;;  %225 = vmatprep.subr.bf16.mxu0 %v646_v11  ;;  %p712_p2 = scmp.ne.s32.totalorder %s552_s24, %s711_s25  ;;  %p716_p3 = scmp.lt.s32.totalorder %s552_s24, %s552_s24 }
  0x34   :  { %v379_v33 = vrot.slane %v368_v31, %v347_v30  ;;  %v819_v34 = vrot.slane %v368_v31, %v343_v29  ;;  %v821_v35 = vrot.slane %v368_v31, %v351_v32  ;;  %v352_v62 = vrot.slane %v339_v52, %v351_v32  ;;  %p717_p4 = scmp.lt.s32.totalorder %s715_s26, %s711_s25 }
  0x35   :  { %v344_v6 = vrot.slane %v339_v52, %v343_v29  ;;  %v348_v8 = vrot.slane %v339_v52, %v347_v30 }
  0x36   :  { %604 = vmatpush3.bf16.msra.mxu1 %v648_v12  ;;  %226 = vmatpush1.bf16.msra.mxu0 %v649_v13  ;;  %p718_p5 = por %p717_p4, %p716_p3 }
  0x37   :  { %605 = vmatprep.subr.bf16.mxu1 %v745_v0  ;;  %227 = vmatprep.subr.bf16.mxu0 %v650_v14 }
  0x38   :  { %p719_p6 = pnand %p718_p5, %p712_p2 }
  0x3a   :  { %606 = vmatpush3.bf16.msra.mxu1 %v652_v15  ;;  %228 = vmatpush1.bf16.msra.mxu0 %v653_v16 }
  0x3b   :  { %607 = vmatprep.subr.bf16.mxu1 %v745_v0  ;;  %229 = vmatprep.subr.bf16.mxu0 %v654_v17 }
  0x3e   :  { %608 = vmatpush3.bf16.msra.mxu1 %v656_v18  ;;  %230 = vmatpush1.bf16.msra.mxu0 %v657_v19 }
  0x3f   :  { %609 = vmatprep.subr.bf16.mxu1 %v745_v0  ;;  %231 = vmatprep.subr.bf16.mxu0 %v658_v20 }
  0x42   :  { %610 = vmatpush3.bf16.msra.mxu1 %v660_v21  ;;  %232 = vmatpush1.bf16.msra.mxu0 %v661_v22 }
  0x43   :  { %611 = vmatprep.subr.bf16.mxu1 %v745_v0  ;;  %233 = vmatprep.subr.bf16.mxu0 %v662_v23 }
  0x46   :  { %612 = vmatpush3.bf16.msra.mxu1 %v664_v24  ;;  %234 = vmatpush1.bf16.msra.mxu0 %v665_v25 }
  0x47   :  { %617 = vmatprep.subr.mxu0 %v745_v0 }
  0x49   :  { %614 = vmatmul.mubr.bf16.vlgmr.msra.gmra.mrb[0].mxu1 %v666_v26  ;;  %252 = vmatmul.mubr.bf16.vlgmr.msra.gmra.mrb[0].mxu0 %v666_v26 }
  0x4a   :  { %619 = vmatprep.mubr.msk.f32.mxu0 %vm746_vm0, %v745_v0  ;;  %467 = vmatprep.mubr.f32.mxu1 %v379_v33 }
 0x11c   :  { %v296_v36 = vpop.f32.mrb[0].mxu1  ;;  %v253_v38 = vpop.f32.mrb[0].mxu0 }
 0x11d   :  { %v315_v37 = vrot.slane %v296_v36, 4  ;;  %v615_v39 = vpop.f32.mrb[1].mxu1  ;;  %v303_v40 = vrot.slane %v253_v38, 4  ;;  %v255_v41 = vpop.f32.mrb[1].mxu0 }
 0x11e   :  { %v299_v42 = vpop.f32.mrb[2].mxu1  ;;  %v309_v44 = vrot.slane %v255_v41, 4  ;;  %v257_v46 = vpop.f32.mrb[2].mxu0 }
 0x11f   :  { %v316_v43 = vmax.f32 %v296_v36, %v315_v37  ;;  %v333_v45 = vrot.slane %v299_v42, 4  ;;  %v616_v47 = vpop.f32.mrb[3].mxu1  ;;  %v304_v48 = vmax.f32 %v253_v38, %v303_v40  ;;  %v321_v49 = vrot.slane %v257_v46, 4  ;;  %v259_v50 = vpop.f32.mrb[3].mxu0 }
 0x120   :  { %v310_v53 = vmax.f32 %v255_v41, %v309_v44  ;;  %v327_v55 = vrot.slane %v259_v50, 4  ;;  %v370_v41 = vstv %s847_s4 }
 0x121   :  { %v317_v51 = vrot.slane %v316_v43, 2  ;;  %v334_v54 = vmax.f32 %v299_v42, %v333_v45  ;;  %v305_v56 = vrot.slane %v304_v48, 2  ;;  %v322_v57 = vmax.f32 %v257_v46, %v321_v49 }
 0x122   :  { %v311_v59 = vrot.slane %v310_v53, 2  ;;  %v328_v61 = vmax.f32 %v259_v50, %v327_v55 }
 0x123   :  { %v318_v58 = vmax.f32 %v316_v43, %v317_v51  ;;  %v335_v60 = vrot.slane %v334_v54, 2  ;;  %v306_v63 = vmax.f32 %v304_v48, %v305_v56  ;;  %v323_v0 = vrot.slane %v322_v57, 2 }
 0x124   :  { %v312_v2 = vmax.f32 %v310_v53, %v311_v59  ;;  %v329_v4 = vrot.slane %v328_v61, 2 }
 0x125   :  { %v319_v1 = vrot.slane %v318_v58, 1  ;;  %v336_v3 = vmax.f32 %v334_v54, %v335_v60  ;;  %v307_v5 = vrot.slane %v306_v63, 1  ;;  %v324_v7 = vmax.f32 %v322_v57, %v323_v0 }
 0x126   :  { %v313_v10 = vrot.slane %v312_v2, 1  ;;  %v330_v12 = vmax.f32 %v328_v61, %v329_v4 }
 0x127   :  { %v320_v9 = vmax.f32 %v318_v58, %v319_v1  ;;  %v337_v11 = vrot.slane %v336_v3, 1  ;;  %v308_v13 = vmax.f32 %v306_v63, %v307_v5  ;;  %v325_v14 = vrot.slane %v324_v7, 1 }
 0x128   :  { %v314_v16 = vmax.f32 %v312_v2, %v313_v10  ;;  %v331_v18 = vrot.slane %v330_v12, 1 }
 0x129   :  { %v358_v15 = vadd.f32 %v352_v62, %v320_v9  ;;  %v338_v17 = vmax.f32 %v336_v3, %v337_v11  ;;  %v356_v19 = vadd.f32 %v344_v6, %v308_v13  ;;  %v326_v20 = vmax.f32 %v324_v7, %v325_v14 }
 0x12a   :  { %v332_v22 = vmax.f32 %v330_v12, %v331_v18  ;;  %v357_v23 = vadd.f32 %v348_v8, %v314_v16 }
 0x12b   :  { %v361_v21 = vadd.f32 %v352_v62, %v338_v17  ;;  %v359_v24 = vadd.f32 %v344_v6, %v326_v20  ;;  %v364_v28 = vmax.f32 %v358_v15, 0.0  ;;  %v362_v31 = vmax.f32 %v356_v19, 0.0 }
 0x12c   :  { %v360_v26 = vadd.f32 %v348_v8, %v332_v22  ;;  %v363_v36 = vmax.f32 %v357_v23, 0.0 }
 0x12d   :  { %v367_v25 = vmax.f32 %v361_v21, 0.0  ;;  %v365_v27 = vmax.f32 %v359_v24, 0.0 }
 0x12e   :  { %v366_v30 = vmax.f32 %v360_v26, 0.0 }
 0x12f   :  { %v398_v29 = vrot.slane %v367_v25, 7  ;;  %v393_v32 = vrot.slane %v365_v27, 7 }
 0x130   :  { %v396_v37 = vrot.slane %v366_v30, 7 }
 0x131   :  { %v399_v33 = vsel %vm394_vm1, %v398_v29, %v364_v28  ;;  %v395_v38 = vsel %vm394_vm1, %v393_v32, %v362_v31 }
 0x132   :  { %618 = vmatpush3.xpose.msra.mxu0 %v399_v33  ;;  %v397_v39 = vsel %vm394_vm1, %v396_v37, %v363_v36 }
 0x133   :  { %403 = vmatprep.subr.mxu1 %v397_v39 }
 0x134   :  { %404 = vmatpush1.xpose.msra.mxu1 %v395_v38 }
 0x135   :  { %620 = vmatmul.mubr.f32.vlgmr.msra.gmra.mrb[4].mxu0 %v821_v35 }
 0x137   :  { %468 = vmatmul.mubr.f32.vlgmr.msra.gmra.mrb[4].mxu1 %v819_v34 }
 0x208   :  { %v539_v40 = vpop.f32.mrb[4].mxu0 }
 0x209   :  { %v621_v42 = vpop.f32.mrb[5].mxu0 }
 0x20a   :  { %v469_v43 = vpop.f32.mrb[4].mxu1 }
 0x20b   :  { %v470_v44 = vadd.f32 %v469_v43, %v370_v41  ;;  %v471_v45 = vpop.f32.mrb[5].mxu1 }
 0x20d   :  { %v540_v46 = vadd.f32 %v539_v40, %v470_v44 }
 0x20f   :  { %544 = vst.msk [vmem:[#allocation8] sm:$0x1] %vm543_vm2, %v540_v46 }
 0x210   :  { %722 = shalt.err (!%p719_p6)
}
 0x211   :  { %s723_s28 = scalar_lea.hbm %s848_s5, 16 }
 0x212   :  { %p724_p7 = scmp.ne.s32.totalorder %s848_s5, %s723_s28  ;;  %p727_p8 = scmp.lt.u32.totalorder %s723_s28, %s848_s5 }
 0x214   :  { %p729_p9 = pnand %p727_p8, %p724_p7 }
 0x216   :  { %732 = shalt.err (!%p729_p9)
}
 0x217   :  { %554 = dma.vmem_to_hbm [thread:$0]  %s552_s24, 16, %s848_s5, [#allocation5]  }
 0x218   :  { %737 = dma.done.wait [#allocation5], 16  }
 0x219   :  { %738 = vsyncadd [#allocation5], 4294967280 }
 0x21a   :  { %558 = vsyncpa [#allocation4], 1 }
 0x21b   :  { %559 = vsyncpa [#allocation7], 1 }
 0x21c   :  { %560 = vsyncpa [#allocation5], 1 }

</bundles_post_ra>
